<compile_context>
chip_gen: v7x
topology: tpu7x:2x2x1
jax: 0.10.0
libtpu: 0.0.40
codegen_flags: <defaults>
</compile_context>

<pallas_src>
import math

import jax
import jax.numpy as jnp
from jax.experimental import pallas as pl
from jax.experimental.pallas import tpu as pltpu

_TWO_PI = 2.0 * math.pi


def _sinusoidal_kernel(x_ref, w_ref, o_ref):
    # x_ref: (TB, 1) f32, w_ref: (1, half_dim) f32, o_ref: (TB, 1 + 2*half_dim)
    half = w_ref.shape[1]

    x = x_ref[...]                          # (TB, 1)
    w_scaled = w_ref[...] * _TWO_PI         # (1, half): scale once per block
    freqs = x * w_scaled                    # (TB, half) broadcast multiply (VPU)

    # Lane-concat sin|cos once (XLU, idle otherwise) -> single wide store
    # instead of two separate masked store streams.
    sincos = jnp.concatenate([jnp.sin(freqs), jnp.cos(freqs)], axis=-1)  # (TB, 2*half)

    o_ref[:, 0:1] = x.astype(o_ref.dtype)
    o_ref[:, 1:1 + 2 * half] = sincos.astype(o_ref.dtype)


def _round_up(v, m):
    return ((v + m - 1) // m) * m


def learned_sinusoidal_pos_emb(x, weights, *, block_b=2048, out_dtype=jnp.float32):
    """x: (B,) float, weights: (half_dim,) float -> (B, 1 + 2*half_dim) out_dtype."""
    B = x.shape[0]
    half_dim = weights.shape[0]
    out_dim = 1 + 2 * half_dim

    # Batch tile: multiple of 8 sublanes. For small B a single block (launch
    # overhead dominates anyway); for larger B aim for >= 2 balanced blocks so
    # the "parallel" grid axis can shard across both TensorCores on v7x.
    if B <= 256:
        tb = max(8, _round_up(B, 8))
    else:
        tb = min(block_b, _round_up(pl.cdiv(B, 2), 8))
    num_blocks = pl.cdiv(B, tb)

    # No wrapper-side padding / slicing: Pallas masks the ragged last block.
    x2 = x.astype(jnp.float32).reshape(B, 1)
    w2 = weights.astype(jnp.float32).reshape(1, half_dim)

    out = pl.pallas_call(
        _sinusoidal_kernel,
        out_shape=jax.ShapeDtypeStruct((B, out_dim), out_dtype),
        grid_spec=pltpu.PrefetchScalarGridSpec(
            num_scalar_prefetch=0,
            grid=(num_blocks,),
            in_specs=[
                pl.BlockSpec((tb, 1), lambda i: (i, 0)),         # x tile
                pl.BlockSpec((1, half_dim), lambda i: (0, 0)),   # weights resident
            ],
            out_specs=pl.BlockSpec((tb, out_dim), lambda i: (i, 0)),
        ),
        compiler_params=pltpu.CompilerParams(
            dimension_semantics=("parallel",),   # megacore shard on v7x
        ),
    )(x2, w2)
    return out


def reference(x, weights):
    freqs = x[:, None].astype(jnp.float32) * weights[None, :].astype(jnp.float32) * _TWO_PI
    return jnp.concatenate(
        [x[:, None].astype(jnp.float32), jnp.sin(freqs), jnp.cos(freqs)], axis=-1
    )


if __name__ == "__main__":
    key = jax.random.PRNGKey(0)
    k_x, k_w, k_x2, k_x3 = jax.random.split(key, 4)

    dim = 32                       # embedding dim (must be even)
    half_dim = dim // 2
    batch = 8

    # Deterministic synthetic params / inputs (module uses torch.randn(half_dim)).
    weights = jax.random.normal(k_w, (half_dim,), dtype=jnp.float32)
    x = jax.random.normal(k_x, (batch,), dtype=jnp.float32)

    out = learned_sinusoidal_pos_emb(x, weights)
    out = jax.block_until_ready(out)
    ref = reference(x, weights)
    assert out.shape == (batch, 1 + dim), out.shape
    assert jnp.allclose(out, ref, atol=1e-5, rtol=1e-5), "mismatch vs reference"

    # Ragged batch (not a multiple of 8) — exercises Pallas boundary masking.
    batch2 = 20
    x_b2 = jax.random.normal(k_x2, (batch2,), dtype=jnp.float32)
    out2 = jax.block_until_ready(learned_sinusoidal_pos_emb(x_b2, weights))
    ref2 = reference(x_b2, weights)
    assert out2.shape == (batch2, 1 + dim), out2.shape
    assert jnp.allclose(out2, ref2, atol=1e-5, rtol=1e-5), "mismatch vs reference (ragged)"

    # Larger batch — exercises the multi-block (>=2 grid steps) path.
    batch3 = 1000
    x_b3 = jax.random.normal(k_x3, (batch3,), dtype=jnp.float32)
    out3 = jax.block_until_ready(learned_sinusoidal_pos_emb(x_b3, weights))
    ref3 = reference(x_b3, weights)
    assert out3.shape == (batch3, 1 + dim), out3.shape
    assert jnp.allclose(out3, ref3, atol=1e-5, rtol=1e-5), "mismatch vs reference (multi-block)"

    print("KERNEL_OK")
</pallas_src>

<mosaic_0001>
module attributes {stable_mosaic.version = 11 : i64} {
  func.func @_sinusoidal_kernel(%arg0: i32, %arg1: memref<8x1xf32, #tpu.memory_space<vmem>>, %arg2: memref<1x16xf32, #tpu.memory_space<vmem>>, %arg3: memref<8x33xf32, #tpu.memory_space<vmem>>) attributes {dimension_semantics = [#tpu.dimension_semantics<parallel>], iteration_bounds = array<i64: 1>, scalar_prefetch = 0 : i64, scratch_operands = 0 : i64, tpu.core_type = #tpu.core_type<tc>, window_params = [{transform_indices = @transform_0, window_bounds = array<i64: 8, 1>}, {pipeline_mode = #tpu.pipeline_mode<synchronous>, transform_indices = @transform_1, window_bounds = array<i64: 1, 16>}, {transform_indices = @transform_2, window_bounds = array<i64: 8, 33>}]} {
    %c0 = arith.constant 0 : index
    %c0_0 = arith.constant 0 : index
    %0 = vector.load %arg1[%c0, %c0_0] : memref<8x1xf32, #tpu.memory_space<vmem>>, vector<8x1xf32>
    %c0_1 = arith.constant 0 : index
    %c0_2 = arith.constant 0 : index
    %1 = vector.load %arg2[%c0_1, %c0_2] : memref<1x16xf32, #tpu.memory_space<vmem>>, vector<1x16xf32>
    %cst = arith.constant 6.28318548 : f32
    %2 = vector.broadcast %cst : f32 to vector<1x16xf32>
    %3 = arith.mulf %1, %2 : vector<1x16xf32>
    %4 = vector.broadcast %0 : vector<8x1xf32> to vector<8x16xf32>
    %5 = vector.broadcast %3 : vector<1x16xf32> to vector<8x16xf32>
    %6 = arith.mulf %4, %5 : vector<8x16xf32>
    %7 = math.sin %6 : vector<8x16xf32>
    %8 = math.cos %6 : vector<8x16xf32>
    %9 = tpu.concatenate %7, %8 in 1 : vector<8x16xf32>, vector<8x16xf32> -> vector<8x32xf32>
    %c0_3 = arith.constant 0 : index
    %c0_4 = arith.constant 0 : index
    %10 = vector.load %arg3[%c0_3, %c0_4] : memref<8x33xf32, #tpu.memory_space<vmem>>, vector<8x1xf32>
    tpu.vector_store %arg3[%c0_3, %c0_4], %0 {strides = array<i32>} : memref<8x33xf32, #tpu.memory_space<vmem>>, vector<8x1xf32>,
    %c0_5 = arith.constant 0 : index
    %c1 = arith.constant 1 : index
    %11 = vector.load %arg3[%c0_5, %c1] : memref<8x33xf32, #tpu.memory_space<vmem>>, vector<8x32xf32>
    tpu.vector_store %arg3[%c0_5, %c1], %9 {strides = array<i32>} : memref<8x33xf32, #tpu.memory_space<vmem>>, vector<8x32xf32>,
    return
  }
  func.func @transform_0(%arg0: i32) -> (i32, i32) {
    %c0_i32 = arith.constant 0 : i32
    %c0_i32_0 = arith.constant 0 : i32
    return %arg0, %c0_i32 : i32, i32
  }
  func.func @transform_1(%arg0: i32) -> (i32, i32) {
    %c0_i32 = arith.constant 0 : i32
    %c0_i32_0 = arith.constant 0 : i32
    %c0_i32_1 = arith.constant 0 : i32
    return %c0_i32, %c0_i32_0 : i32, i32
  }
  func.func @transform_2(%arg0: i32) -> (i32, i32) {
    %c0_i32 = arith.constant 0 : i32
    %c0_i32_0 = arith.constant 0 : i32
    return %arg0, %c0_i32 : i32, i32
  }
}

</mosaic_0001>

<bundles_post_ra>
// kernel: tpu_custom_call.1
= control target key start
LH: loop header
LB: loop body
LE: loop exit
PB: predicated region body
PF: predicated region fallthrough
CT: control target
= control target key end

     0   :  { %vm240_vm0 = vcmask 7168   ;;  %v313_v1 = vmov 0   ;;  %s377_s0 = inlined_call_operand.vmem [shape: f32[8,1], index: 0, kind: input, shape index: {}]   ;;  %s378_s1 = inlined_call_operand.vmem [shape: f32[1,16], index: 1, kind: input, shape index: {}]   ;;  %s379_s2 = inlined_call_operand.hbm [shape: f32[8,33], index: 2, kind: output, shape index: {}]  }
   0x1   :  { %v12_v0 = vld [vmem:[%s377_s0] sm:$0xff]  ;;  %284 = vset.pattern.permute.xlu0 %v313_v1 }
   0x2   :  { %241 = vst.msk [vmem:[#allocation2] sm:$0xff] %vm240_vm0, %v12_v0  ;;  %17 = vperm.xlu0 %284, %v12_v0  }
   0x3   :  { %7 = vsyncpa [#allocation3], 0  ;;  %v21_v2 = vlaneseq  ;;  %v13_v4 = vld [vmem:[%s378_s1] sm:$0x1]  ;;  %v314_v20 = vmov 683565275  }
   0x4   :  { %v14_v5 = vmul.f32 6.2831855, %v13_v4  ;;  %v315_v22 = vmov 2475754826   ;;  %v316_v25 = vmov 2131351028  }
   0x5   :  { %v22_v3 = vshrl.u32 %v21_v2, 7  ;;  %v317_v28 = vmov 2102212464   ;;  %v318_v31 = vmov 920167782   ;;  %s320_s0 = smov 16  }
   0x6   :  { %v319_v34 = vmov 1326507024   ;;  %s321_s1 = smov 1   ;;  %s322_s13 = smov [#allocation2]  }
   0x7   :  { %v23_v6 = vsub.s32 0, %v22_v3  ;;  %s254_s14 = sshll.u32 %s322_s13, 4  ;;  %s255_s14 = int_to_ptr.vmem [resolvable:$true] %s254_s14 }
   0x8   :  { %s289_s15 = scalar_lea.vmem %s255_s14, 128  ;;  %p294_p1 = scmp.lt.s32.totalorder %s255_s14, %s255_s14 }
   0x9   :  { %v24_v7 = vrot.slane %v14_v5, %v23_v6  ;;  %p290_p0 = scmp.ne.s32.totalorder %s255_s14, %s289_s15  ;;  %p295_p2 = scmp.lt.s32.totalorder %s289_s15, %s289_s15 }
   0xb   :  { %p296_p3 = por %p295_p2, %p294_p1 }
   0xd   :  { %p297_p4 = pnand %p296_p3, %p290_p0 }
  0x81   :  { %v18_v8 = vpop.permute.xlu0 %17 }
  0x82   :  { %v344_v9 = vmul.f32 %v24_v7, %v18_v8 }
  0x84   :  { %v30_v10 = vand.u32 2139095040, %v344_v9  ;;  %v27_v14 = vand.u32 2147483647, %v344_v9  ;;  %vm29_vm8 = vcmp.lt.s32.totalorder %v344_v9, 0  ;;  %vm119_vm0 = vweird.f32 %v344_v9 }
  0x86   :  { %v31_v11 = vshrl.u32 %v30_v10, 23  ;;  %v34_v17 = vand.u32 8388607, %v27_v14  ;;  %vm28_vm9 = vcmp.le.f32.partialorder %v27_v14, 0.7853982 }
  0x88   :  { %v262_v12 = vadd.s32 4294967169, %v31_v11  ;;  %v35_v36 = vor.u32 8388608, %v34_v17 }
  0x8a   :  { %v37_v13 = vadd.s32 1, %v262_v12  ;;  %v75_v50 = vshll.u32 %v35_v36, 8 }
  0x8c   :  { %vm38_vm1 = vcmp.gt.s32.totalorder %v37_v13, 0 }
  0x8d   :  { %v39_v15 = vsel %vm38_vm1, %v37_v13, 0  ;;  %vm238_vm1 = vcmask 130048  }
  0x8e   :  { %v41_v16 = vand.u32 31, %v39_v15  ;;  %v40_v19 = vshrl.u32 %v39_v15, 5 }
  0x90   :  { %v42_v18 = vsub.s32 32, %v41_v16  ;;  %v44_v21 = vshll.u32 %v314_v20, %v41_v16  ;;  %v47_v23 = vshll.u32 %v315_v22, %v41_v16  ;;  %v50_v27 = vshll.u32 %v316_v25, %v41_v16 }
  0x91   :  { %v53_v30 = vshll.u32 %v317_v28, %v41_v16  ;;  %v56_v33 = vshll.u32 %v318_v31, %v41_v16  ;;  %vm59_vm2 = vcmp.lt.s32.totalorder %v40_v19, 1  ;;  %vm62_vm3 = vcmp.lt.s32.totalorder %v40_v19, 4 }
  0x92   :  { %v45_v24 = vshrl.u32 %v315_v22, %v42_v18  ;;  %v48_v26 = vshrl.u32 %v316_v25, %v42_v18  ;;  %v51_v29 = vshrl.u32 %v317_v28, %v42_v18  ;;  %v54_v32 = vshrl.u32 %v318_v31, %v42_v18 }
  0x93   :  { %v57_v35 = vshrl.u32 %v319_v34, %v42_v18  ;;  %v43_v45 = vshrl.u32 %v314_v20, %v42_v18  ;;  %vm61_vm4 = vcmp.lt.s32.totalorder %v40_v19, 3  ;;  %vm60_vm5 = vcmp.lt.s32.totalorder %v40_v19, 2 }
  0x94   :  { %v46_v37 = vor.u32 %v45_v24, %v44_v21  ;;  %v49_v38 = vor.u32 %v48_v26, %v47_v23  ;;  %v52_v39 = vor.u32 %v51_v29, %v50_v27  ;;  %v55_v40 = vor.u32 %v54_v32, %v53_v30 }
  0x95   :  { %v58_v41 = vor.u32 %v57_v35, %v56_v33 }
  0x96   :  { %v64_v42 = vsel %vm62_vm3, %v52_v39, 2102212464  ;;  %v67_v43 = vsel %vm59_vm2, %v46_v37, %v49_v38  ;;  %v71_v44 = vsel %vm59_vm2, %v49_v38, %v52_v39  ;;  %v68_v46 = vsel %vm62_vm3, %v55_v40, 920167782 }
  0x97   :  { %v72_v47 = vsel %vm62_vm3, %v58_v41, 1326507024  ;;  %v69_v48 = vsel %vm61_vm4, %v52_v39, %v68_v46  ;;  %v63_v51 = vsel %vm59_vm2, %v43_v45, %v46_v37  ;;  %v65_v52 = vsel %vm61_vm4, %v49_v38, %v64_v42 }
  0x98   :  { %v73_v49 = vsel %vm61_vm4, %v55_v40, %v72_v47  ;;  %v70_v53 = vsel %vm60_vm5, %v67_v43, %v69_v48  ;;  %v66_v59 = vsel %vm60_vm5, %v63_v51, %v65_v52  ;;  %vm246_vm2 = vcmask 269320  }
  0x99   :  { %v74_v54 = vsel %vm60_vm5, %v71_v44, %v73_v49  ;;  %v353_v57 = vmul.u32.u64.low %v75_v50, %v70_v53  ;;  %v354_v58 = vmul.u32.u64.high %v75_v50, %v70_v53, %v353_v57  ;;  %v82_v61 = vmul.u32 %v75_v50, %v66_v59 }
  0x9a   :  { %v350_v55 = vmul.u32.u64.low %v75_v50, %v74_v54  ;;  %v351_v56 = vmul.u32.u64.high %v75_v50, %v74_v54, %v350_v55 }
  0x9b   :  { %v85_v60 = vadd.s32 1, %v354_v58 }
  0x9c   :  { %vm84_vm6 = vc.u32 %v351_v56, %v353_v57  ;;  %v83_v10 = vadd.s32 %v353_v57, %v351_v56 }
  0x9d   :  { %v86_v62 = vsel %vm84_vm6, %v85_v60, %v354_v58 }
  0x9e   :  { %v87_v63 = vadd.s32 %v86_v62, %v82_v61 }
  0xa0   :  { %v88_v0 = vadd.s32 536870912, %v87_v63 }
  0xa2   :  { %v89_v1 = vshrl.u32 %v88_v0, 30 }
  0xa4   :  { %v90_v2 = vshll.u32 %v89_v1, 30  ;;  %v113_v23 = vsub.s32 4, %v89_v1 }
  0xa6   :  { %v91_v3 = vsub.s32 %v87_v63, %v90_v2  ;;  %v114_v26 = vsel %vm29_vm8, %v113_v23, %v89_v1 }
  0xa7   :  { %v116_v28 = vsel %vm28_vm9, 0, %v114_v26 }
  0xa8   :  { %v93_v4 = vsub.s32 0, %v91_v3  ;;  %v120_v29 = vadd.s32 3, %v116_v28  ;;  %v224_v30 = vand.u32 3, %v116_v28 }
  0xaa   :  { %v263_v5 = vmin.u32 %v93_v4, %v91_v3  ;;  %v121_v31 = vand.u32 3, %v120_v29  ;;  %vm229_vm10 = vcmp.eq.s32.totalorder %v224_v30, 2  ;;  %vm226_vm12 = vcmp.eq.s32.totalorder %v224_v30, 0 }
  0xab   :  { %vm225_vm14 = vcmp.lt.s32.totalorder %v224_v30, 2 }
  0xac   :  { %v95_v6 = vclz %v263_v5  ;;  %vm126_vm11 = vcmp.eq.s32.totalorder %v121_v31, 2  ;;  %vm123_vm13 = vcmp.eq.s32.totalorder %v121_v31, 0  ;;  %vm122_vm15 = vcmp.lt.s32.totalorder %v121_v31, 2 }
  0xae   :  { %v264_v7 = vadd.s32 4294967294, %v95_v6 }
  0xb0   :  { %vm265_vm7 = vcmp.lt.s32.totalorder %v264_v7, 0 }
  0xb1   :  { %v98_v8 = vsel %vm265_vm7, 0, %v264_v7 }
  0xb2   :  { %v99_v11 = vsub.s32 32, %v98_v8  ;;  %v103_v12 = vsub.s32 4294967266, %v98_v8  ;;  %v100_v13 = vshll.u32 %v91_v3, %v98_v8 }
  0xb4   :  { %v101_v15 = vshrl.u32 %v83_v10, %v99_v11  ;;  %v104_v16 = vadd.s32 127, %v103_v12 }
  0xb6   :  { %v102_v17 = vor.u32 %v101_v15, %v100_v13  ;;  %v105_v18 = vshll.u32 %v104_v16, 23 }
  0xb8   :  { %v106_v19 = vor.u32 4788187, %v105_v18  ;;  %v109_v21 = vcvt.s32.f32 %v102_v17 }
  0xba   :  { %v107_v20 = vand.u32 2147483647, %v106_v19 }
  0xbc   :  { %v110_v22 = vmul.f32 %v109_v21, %v107_v20 }
  0xbe   :  { %v111_v24 = vxor.u32 2147483648, %v110_v22 }
  0xc0   :  { %v112_v25 = vsel %vm29_vm8, %v111_v24, %v110_v22 }
  0xc1   :  { %v115_v27 = vsel %vm28_vm9, %v344_v9, %v112_v25 }
  0xc2   :  { %285 = vcosq.f32 %v115_v27 }
  0xc3   :  { %287 = vsinq.f32 %v115_v27 }
  0xcc   :  { %v286_v32 = vpop.eup %285 }
  0xcd   :  { %v288_v33 = vpop.eup %287  ;;  %v127_v34 = vxor.u32 2147483648, %v286_v32 }
  0xce   :  { %v124_v35 = vxor.u32 2147483648, %v288_v33 }
  0xcf   :  { %v231_v36 = vsel %vm229_vm10, %v127_v34, %v288_v33  ;;  %v128_v37 = vsel %vm126_vm11, %v127_v34, %v288_v33 }
  0xd0   :  { %v228_v14 = vsel %vm226_vm12, %v286_v32, %v124_v35  ;;  %v125_v38 = vsel %vm123_vm13, %v286_v32, %v124_v35 }
  0xd1   :  { %v232_v39 = vsel %vm225_vm14, %v228_v14, %v231_v36  ;;  %v129_v40 = vsel %vm122_vm15, %v125_v38, %v128_v37 }
  0xd2   :  { %v233_v41 = vsel %vm119_vm0, nan, %v232_v39  ;;  %v130_v42 = vsel %vm119_vm0, nan, %v129_v40 }
  0xd3   :  { %235 = vrot.lane.b32.xlu0 %v233_v41, %s320_s0 }
 0x145   :  { %v236_v43 = vpop.permute.xlu0 %235 }
 0x146   :  { %v239_v44 = vsel %vm238_vm1, %v130_v42, %v236_v43 }
 0x147   :  { %243 = vrot.lane.b32.xlu1 %v239_v44, %s321_s1 }
 0x1b9   :  { %v244_v45 = vpop.permute.xlu1 %243 }
 0x1ba   :  { %247 = vst.msk [vmem:[#allocation2] sm:$0xff] %vm246_vm2, %v244_v45 }
 0x1bb   :  { %300 = shalt.err (!%p297_p4)
}
 0x1bc   :  { %s301_s18 = scalar_lea.hbm %s379_s2, 128 }
 0x1bd   :  { %p302_p5 = scmp.ne.s32.totalorder %s379_s2, %s301_s18  ;;  %p305_p6 = scmp.lt.u32.totalorder %s301_s18, %s379_s2 }
 0x1bf   :  { %p307_p7 = pnand %p305_p6, %p302_p5 }
 0x1c1   :  { %310 = shalt.err (!%p307_p7)
}
 0x1c2   :  { %257 = dma.vmem_to_hbm [thread:$0]  %s255_s14, 128, %s379_s2, [#allocation3]  }
 0x1c3   :  { %311 = dma.done.wait [#allocation3], 128  }
 0x1c4   :  { %312 = vsyncadd [#allocation3], 4294967168 }
 0x1c5   :  { %261 = vsyncpa [#allocation3], 1 }

</bundles_post_ra>
